<compile_context>
chip_gen: v6e
topology: v6e:2x2x1
jax: 0.10.0
libtpu: 0.0.40
codegen_flags: <defaults>
</compile_context>

<pallas_src>
import functools

import jax
import jax.numpy as jnp
import numpy as np
from jax.experimental import pallas as pl
from jax.experimental.pallas import tpu as pltpu


# ----------------------------- kernel -----------------------------

def _basic_block_kernel(x_ref, wcol_ref, w2_ref, fc1w_ref, fc2w_ref, rows_ref, o_ref,
                        *, b, lout, p_pad, h_pad):
    f32 = jnp.float32
    bf16 = jnp.bfloat16
    dot = lambda a, w: jnp.dot(a, w, preferred_element_type=f32)

    xa = x_ref[...]                                    # (b*lout, n_dt*stride*Cin) bf16

    # conv1 + downsample conv: ONE fused MXU matmul.
    # Weight columns [0:p_pad) = conv1*bn1_scale, [p_pad:2*p_pad) = downsample*bn_down_scale.
    acc = dot(xa, wcol_ref[...])                       # (b*lout, 2*p_pad) f32

    rows = rows_ref[...]                               # (8, p_pad) f32 packed bias rows
    bn1b = rows[0:1, :]
    b2 = rows[1:2, :]                                  # bn2_bias @ W2^T (folded)
    bndb = rows[2:3, :]
    fc2b = rows[3:4, :]
    fc1b = rows[4:5, :h_pad]

    residual = acc[:, p_pad:] + bndb                   # downsample conv + bn_down
    out1 = jnp.maximum(acc[:, :p_pad] + bn1b, 0.0)     # conv1 + bn1 + relu
    # TODO(synk): Dropout(p=0.2) is identity here (eval mode); train-mode RNG masking not reproduced.
    out2 = dot(out1.astype(bf16), w2_ref[...]) + b2    # bn2 (folded) + 1x1 conv2

    # --- squeeze-excite, batched over the b samples of this block ---
    if b == 1:
        gap = jnp.mean(out2, axis=0, keepdims=True)                   # (1, p_pad) f32
    else:
        col = jax.lax.broadcasted_iota(jnp.int32, (b, b * lout), 1)
        row = jax.lax.broadcasted_iota(jnp.int32, (b, b * lout), 0)
        pool = jnp.where(col // lout == row, 1.0 / lout, 0.0).astype(f32)
        gap = dot(pool, out2)                                         # (b, p_pad) per-sample mean

    hh = jnp.maximum(dot(gap.astype(bf16), fc1w_ref[...]) + fc1b, 0.0)
    s = jax.nn.sigmoid(dot(hh.astype(bf16), fc2w_ref[...]) + fc2b)    # (b, p_pad)

    if b == 1:
        s_rows = s                                                    # broadcasts over rows
    else:
        r0 = jax.lax.broadcasted_iota(jnp.int32, (b * lout, b), 0) // lout
        r1 = jax.lax.broadcasted_iota(jnp.int32, (b * lout, b), 1)
        sel = jnp.where(r0 == r1, 1.0, 0.0).astype(f32)
        s_rows = dot(sel, s)                                          # (b*lout, p_pad)

    o_ref[...] = jnp.maximum(s_rows * out2 + residual, 0.0).astype(o_ref.dtype)


# ----------------------------- host-side prep (one-time) -----------------------------

def _fold_bn(gamma, beta, mean, var, eps=1e-5):
    scale = gamma / jnp.sqrt(var + eps)
    return scale, beta - mean * scale


def _round_up(x, m):
    return ((x + m - 1) // m) * m


def prepare_block_params(params, *, stride, eps=1e-5):
    """One-time packing: fold BatchNorms, fuse conv1|downsample weights, pad & cast.

    Hoisted out of the per-call hot path (perf review)."""
    w1 = params["conv1_w"]                             # (P, Cin, K)
    p, cin, k = w1.shape
    h = params["fc1_w"].shape[0]
    p_pad = _round_up(p, 128)
    h_pad = _round_up(h, 128)
    sc = stride * cin
    n_dt = (k - 1) // stride + 1                       # number of distinct tap shifts
    kdim = n_dt * sc

    bn1s, bn1b = _fold_bn(*params["bn1"], eps)
    bn2s, bn2b = _fold_bn(*params["bn2"], eps)
    bnds, bndb = _fold_bn(*params["bn_down"], eps)

    w1f = jnp.transpose(w1, (2, 1, 0)) * bn1s[None, None, :]                 # (K, Cin, P)
    wdf = jnp.transpose(params["down_conv_w"], (2, 1, 0)) * bnds[None, None, :]

    # Fused conv1|downsample weight slab over the im2col layout:
    # row index dt*stride*Cin + j*Cin + c corresponds to tap t = dt*stride + j.
    wcol = jnp.zeros((kdim, 2 * p_pad), jnp.float32)
    for t in range(k):
        dt, j = divmod(t, stride)
        r0 = dt * sc + j * cin
        wcol = wcol.at[r0:r0 + cin, 0:p].set(w1f[t])
        wcol = wcol.at[r0:r0 + cin, p_pad:p_pad + p].set(wdf[t])
    wcol = wcol.astype(jnp.bfloat16)

    # bn2 is applied BEFORE the bias-free 1x1 conv2 -> fold scale into rows + bias row.
    w2_f = jnp.transpose(params["conv2_w"][:, :, 0], (1, 0))                 # (P_in, P_out)
    w2_fold = bn2s[:, None] * w2_f
    b2_row = bn2b @ w2_f
    w2p = jnp.zeros((p_pad, p_pad), jnp.float32).at[:p, :p].set(w2_fold).astype(jnp.bfloat16)

    fc1w = jnp.zeros((p_pad, h_pad), jnp.float32).at[:p, :h].set(
        jnp.transpose(params["fc1_w"])).astype(jnp.bfloat16)
    fc2w = jnp.zeros((h_pad, p_pad), jnp.float32).at[:h, :p].set(
        jnp.transpose(params["fc2_w"])).astype(jnp.bfloat16)

    # All bias rows packed into one (8, p_pad) operand (single small DMA).
    rows = jnp.zeros((8, p_pad), jnp.float32)
    rows = rows.at[0, :p].set(bn1b)
    rows = rows.at[1, :p].set(b2_row)
    rows = rows.at[2, :p].set(bndb)
    rows = rows.at[3, :p].set(params["fc2_b"])
    rows = rows.at[4, :h].set(params["fc1_b"])

    return {
        "wcol": wcol, "w2": w2p, "fc1w": fc1w, "fc2w": fc2w, "rows": rows,
        "stride": stride, "k": k, "cin": cin, "p": p, "p_pad": p_pad,
        "h": h, "h_pad": h_pad, "n_dt": n_dt, "kdim": kdim,
    }


# ----------------------------- forward (hot path) -----------------------------

def _choose_samples_per_step(n, lout, requested=None):
    if requested is not None:
        b = int(requested)
    else:
        # ~256 output rows per step; keep >= 2 grid steps so both v7x TCs get work.
        b = min(max(1, 256 // max(lout, 1)), max(1, n // 2))
    b = max(1, min(b, n))
    # Non-full blocks need sublane-aligned row counts (bf16 tile: 16 rows).
    if _round_up(n, b) // b > 1 and (b * lout) % 16 != 0:
        b = next((c for c in range(b, 0, -1) if (c * lout) % 16 == 0), n)
    return b


def _vmem_limit_bytes(rows_per_step, kdim, p_pad, h_pad, single_buffer):
    wb = 1 if single_buffer else 2
    weights = 2 * (kdim * 2 * p_pad + p_pad * p_pad + p_pad * h_pad + h_pad * p_pad) \
        + 4 * 8 * p_pad
    io = 2 * 2 * rows_per_step * kdim + 2 * 2 * rows_per_step * p_pad      # double-buffered bf16
    live = 4 * rows_per_step * (2 * p_pad) * 4                             # f32 intermediates headroom
    need = wb * weights + io + live
    return int(min(max(2 * need, 4 << 20), 64 << 20))


def basic_block1d_forward(x4, packed, *, samples_per_step=None):
    """Hot path: x transform + pallas_call only (weights pre-packed by prepare_block_params)."""
    stride, k, cin = packed["stride"], packed["k"], packed["cin"]
    p, p_pad, h_pad = packed["p"], packed["p_pad"], packed["h_pad"]
    n_dt, kdim = packed["n_dt"], packed["kdim"]

    # x4: (N, C_in, 1, L) -- PyTorch NCHW with H == 1; the module does x.squeeze(2).
    x = jnp.squeeze(x4, axis=2)                        # (N, Cin, L)
    n, cin_x, length = x.shape
    assert cin_x == cin
    sc = stride * cin
    lout = (length - k) // stride + 1
    r = lout + n_dt - 1

    b = _choose_samples_per_step(n, lout, samples_per_step)
    n_pad = _round_up(n, b)
    g = n_pad // b
    rows_per_step = b * lout

    # stride-phase split + bounded im2col (duplication factor only n_dt = ceil(K/stride)):
    #   xcol[n, l, dt*stride*Cin + j*Cin + c] = x[n, c, (l + dt)*stride + j]
    x_t = jnp.transpose(x, (0, 2, 1))                  # (N, L, Cin)
    lp = r * stride
    if lp >= length:
        x_t = jnp.pad(x_t, ((0, 0), (0, lp - length), (0, 0)))
    else:
        x_t = x_t[:, :lp, :]                           # trailing samples never used
    xps = x_t.reshape(n, r, sc)
    xcol = jnp.concatenate([xps[:, dt:dt + lout, :] for dt in range(n_dt)], axis=-1)
    if n_pad > n:
        xcol = jnp.pad(xcol, ((0, n_pad - n), (0, 0), (0, 0)))
    xflat = xcol.reshape(n_pad * lout, kdim).astype(jnp.bfloat16)

    kern = functools.partial(_basic_block_kernel, b=b, lout=lout, p_pad=p_pad, h_pad=h_pad)

    def run(single_buffer):
        def const_spec(shape):
            if single_buffer:
                return pl.BlockSpec(shape, lambda i: (0,) * len(shape),
                                    pipeline_mode=pl.Buffered(1))
            return pl.BlockSpec(shape, lambda i: (0,) * len(shape))

        out = pl.pallas_call(
            kern,
            out_shape=jax.ShapeDtypeStruct((n_pad * lout, p_pad), jnp.bfloat16),
            grid=(g,),
            in_specs=[
                pl.BlockSpec((rows_per_step, kdim), lambda i: (i, 0)),   # per-step im2col slab
                const_spec((kdim, 2 * p_pad)),                           # fused conv1|down weights
                const_spec((p_pad, p_pad)),                              # conv2 (bn2-folded)
                const_spec((p_pad, h_pad)),                              # fc1
                const_spec((h_pad, p_pad)),                              # fc2
                const_spec((8, p_pad)),                                  # packed bias rows
            ],
            out_specs=pl.BlockSpec((rows_per_step, p_pad), lambda i: (i, 0)),
            compiler_params=pltpu.CompilerParams(
                dimension_semantics=("parallel",),
                vmem_limit_bytes=_vmem_limit_bytes(rows_per_step, kdim, p_pad, h_pad,
                                                   single_buffer)),
        )(xflat, packed["wcol"], packed["w2"], packed["fc1w"], packed["fc2w"], packed["rows"])
        return jax.block_until_ready(out)

    try:
        # constant-index-map weights never change across the grid -> single buffer them.
        out = run(single_buffer=True)
    except Exception:
        # Fallback to default double-buffered pipelining if Buffered(1) is unsupported.
        out = run(single_buffer=False)

    out = out.reshape(n_pad, lout, p_pad)[:n, :, :p]
    # back to PyTorch (N, P, L_out) layout; drop channel padding; f32 for the caller.
    return jnp.transpose(out, (0, 2, 1)).astype(jnp.float32)


# ----------------------------- pure-JAX reference & params -----------------------------

def ref_forward(x4, params, *, stride):
    """Pure-JAX f32 reference mirroring the PyTorch forward (eval mode)."""
    x = jnp.squeeze(x4, axis=2)

    def conv1d(inp, w, s):
        return jax.lax.conv_general_dilated(
            inp, w, window_strides=(s,), padding="VALID",
            dimension_numbers=("NCH", "OIH", "NCH"))

    def bn(inp, prm):
        scale, bias = _fold_bn(*prm)
        return inp * scale[None, :, None] + bias[None, :, None]

    residual = bn(conv1d(x, params["down_conv_w"], stride), params["bn_down"])
    out = conv1d(x, params["conv1_w"], stride)
    out = jnp.maximum(bn(out, params["bn1"]), 0.0)
    out = bn(out, params["bn2"])
    out = conv1d(out, params["conv2_w"], 1)
    original = out
    g = jnp.mean(out, axis=2)                          # (N, P)
    hh = jnp.maximum(g @ params["fc1_w"].T + params["fc1_b"], 0.0)
    s = jax.nn.sigmoid(hh @ params["fc2_w"].T + params["fc2_b"])
    out = s[:, :, None] * original + residual
    return jnp.maximum(out, 0.0)


def init_params(key, inplanes, planes, size):
    keys = jax.random.split(key, 10)
    hidden = int(round(planes / 16))

    def rand(kk, shape, scale=0.1):
        return (scale * jax.random.normal(kk, shape)).astype(jnp.float32)

    def bn_params(kk):
        k1, k2, k3, k4 = jax.random.split(kk, 4)
        gamma = 1.0 + 0.1 * jax.random.normal(k1, (planes,))
        beta = 0.1 * jax.random.normal(k2, (planes,))
        mean = 0.1 * jax.random.normal(k3, (planes,))
        var = 0.5 + jax.random.uniform(k4, (planes,))
        return tuple(v.astype(jnp.float32) for v in (gamma, beta, mean, var))

    return {
        "conv1_w": rand(keys[0], (planes, inplanes, size)),
        "conv2_w": rand(keys[1], (planes, planes, 1)),
        "down_conv_w": rand(keys[2], (planes, inplanes, size)),
        "bn1": bn_params(keys[3]),
        "bn2": bn_params(keys[4]),
        "bn_down": bn_params(keys[5]),
        "fc1_w": rand(keys[6], (hidden, planes)),
        "fc1_b": rand(keys[7], (hidden,)),
        "fc2_w": rand(keys[8], (planes, hidden)),
        "fc2_b": rand(keys[9], (planes,)),
    }


if __name__ == "__main__":
    # small shapes: batch=2, inplanes=4, planes=32 (round(32/16)=2), size=3, stride=2, L=33 -> L_out=16
    N, inplanes, planes, size, stride, L = 2, 4, 32, 3, 2, 33
    key = jax.random.PRNGKey(0)
    kx, kp = jax.random.split(key)
    x4 = jax.random.normal(kx, (N, inplanes, 1, L), dtype=jnp.float32)
    params = init_params(kp, inplanes, planes, size)

    packed = prepare_block_params(params, stride=stride)      # one-time weight packing
    ref = ref_forward(x4, params, stride=stride)
    lout = (L - size) // stride + 1

    # Default heuristic path: 1 sample/step here -> 2 grid steps (exercises the grid index maps).
    out = basic_block1d_forward(x4, packed)
    out = jax.block_until_ready(out)
    assert out.shape == ref.shape == (N, planes, lout)
    np.testing.assert_allclose(np.asarray(out), np.asarray(ref), atol=2e-2, rtol=2e-2)

    # Batched-per-step path: both samples in one grid step, batched SE matmuls (M = B).
    out_b = basic_block1d_forward(x4, packed, samples_per_step=2)
    out_b = jax.block_until_ready(out_b)
    np.testing.assert_allclose(np.asarray(out_b), np.asarray(ref), atol=2e-2, rtol=2e-2)

    print("KERNEL_OK")
</pallas_src>

<mosaic_0001>
module attributes {stable_mosaic.version = 11 : i64} {
  func.func @_basic_block_kernel(%arg0: i32, %arg1: memref<16x16xbf16, #tpu.memory_space<vmem>>, %arg2: memref<16x256xbf16, #tpu.memory_space<vmem>>, %arg3: memref<128x128xbf16, #tpu.memory_space<vmem>>, %arg4: memref<128x128xbf16, #tpu.memory_space<vmem>>, %arg5: memref<128x128xbf16, #tpu.memory_space<vmem>>, %arg6: memref<8x128xf32, #tpu.memory_space<vmem>>, %arg7: memref<16x128xbf16, #tpu.memory_space<vmem>>) attributes {dimension_semantics = [#tpu.dimension_semantics<parallel>], iteration_bounds = array<i64: 2>, scalar_prefetch = 0 : i64, scratch_operands = 0 : i64, tpu.core_type = #tpu.core_type<tc>, window_params = [{transform_indices = @transform_0, window_bounds = array<i64: 16, 16>}, {pipeline_mode = #tpu.pipeline_mode<synchronous>, transform_indices = @transform_1, window_bounds = array<i64: 16, 256>}, {pipeline_mode = #tpu.pipeline_mode<synchronous>, transform_indices = @transform_2, window_bounds = array<i64: 128, 128>}, {pipeline_mode = #tpu.pipeline_mode<synchronous>, transform_indices = @transform_3, window_bounds = array<i64: 128, 128>}, {pipeline_mode = #tpu.pipeline_mode<synchronous>, transform_indices = @transform_4, window_bounds = array<i64: 128, 128>}, {pipeline_mode = #tpu.pipeline_mode<synchronous>, transform_indices = @transform_5, window_bounds = array<i64: 8, 128>}, {transform_indices = @transform_6, window_bounds = array<i64: 16, 128>}]} {
    %c0 = arith.constant 0 : index
    %c0_0 = arith.constant 0 : index
    %0 = vector.load %arg1[%c0, %c0_0] : memref<16x16xbf16, #tpu.memory_space<vmem>>, vector<16x16xbf16>
    %c0_1 = arith.constant 0 : index
    %c0_2 = arith.constant 0 : index
    %1 = vector.load %arg2[%c0_1, %c0_2] : memref<16x256xbf16, #tpu.memory_space<vmem>>, vector<16x256xbf16>
    %cst = arith.constant dense<0.000000e+00> : vector<16x256xf32>
    %2 = tpu.matmul %0, %1, %cst {dimension_numbers = #tpu.dot_dimension_numbers<[1], [0], [0], [1], [0, 0, 1, 1], [], []>} : vector<16x16xbf16>, vector<16x256xbf16>, vector<16x256xf32> -> vector<16x256xf32>
    %c0_3 = arith.constant 0 : index
    %c0_4 = arith.constant 0 : index
    %3 = vector.load %arg6[%c0_3, %c0_4] : memref<8x128xf32, #tpu.memory_space<vmem>>, vector<8x128xf32>
    %4 = vector.extract_strided_slice %3 {offsets = [0, 0], sizes = [1, 128], strides = [1, 1]} : vector<8x128xf32> to vector<1x128xf32>
    %5 = vector.extract_strided_slice %3 {offsets = [1, 0], sizes = [1, 128], strides = [1, 1]} : vector<8x128xf32> to vector<1x128xf32>
    %6 = vector.extract_strided_slice %3 {offsets = [2, 0], sizes = [1, 128], strides = [1, 1]} : vector<8x128xf32> to vector<1x128xf32>
    %7 = vector.extract_strided_slice %3 {offsets = [3, 0], sizes = [1, 128], strides = [1, 1]} : vector<8x128xf32> to vector<1x128xf32>
    %8 = vector.extract_strided_slice %3 {offsets = [4, 0], sizes = [1, 128], strides = [1, 1]} : vector<8x128xf32> to vector<1x128xf32>
    %9 = vector.extract_strided_slice %2 {offsets = [0, 128], sizes = [16, 128], strides = [1, 1]} : vector<16x256xf32> to vector<16x128xf32>
    %10 = vector.broadcast %6 : vector<1x128xf32> to vector<16x128xf32>
    %11 = arith.addf %9, %10 : vector<16x128xf32>
    %12 = vector.extract_strided_slice %2 {offsets = [0, 0], sizes = [16, 128], strides = [1, 1]} : vector<16x256xf32> to vector<16x128xf32>
    %13 = vector.broadcast %4 : vector<1x128xf32> to vector<16x128xf32>
    %14 = arith.addf %12, %13 : vector<16x128xf32>
    %cst_5 = arith.constant 0.000000e+00 : f32
    %15 = vector.broadcast %cst_5 : f32 to vector<16x128xf32>
    %16 = arith.maximumf %14, %15 : vector<16x128xf32>
    %17 = arith.truncf %16 : vector<16x128xf32> to vector<16x128xbf16>
    %c0_6 = arith.constant 0 : index
    %c0_7 = arith.constant 0 : index
    %18 = vector.load %arg3[%c0_6, %c0_7] : memref<128x128xbf16, #tpu.memory_space<vmem>>, vector<128x128xbf16>
    %cst_8 = arith.constant dense<0.000000e+00> : vector<16x128xf32>
    %19 = tpu.matmul %17, %18, %cst_8 {dimension_numbers = #tpu.dot_dimension_numbers<[1], [0], [0], [1], [0, 0, 1, 1], [], []>} : vector<16x128xbf16>, vector<128x128xbf16>, vector<16x128xf32> -> vector<16x128xf32>
    %20 = vector.broadcast %5 : vector<1x128xf32> to vector<16x128xf32>
    %21 = arith.addf %19, %20 : vector<16x128xf32>
    %cst_9 = arith.constant dense<0.000000e+00> : vector<128xf32>
    %22 = vector.multi_reduction <add>, %21, %cst_9 [0] : vector<16x128xf32> to vector<128xf32>
    %23 = vector.shape_cast %22 : vector<128xf32> to vector<1x128xf32>
    %cst_10 = arith.constant 1.600000e+01 : f32
    %24 = vector.broadcast %cst_10 : f32 to vector<1x128xf32>
    %25 = arith.divf %23, %24 : vector<1x128xf32>
    %26 = arith.truncf %25 : vector<1x128xf32> to vector<1x128xbf16>
    %c0_11 = arith.constant 0 : index
    %c0_12 = arith.constant 0 : index
    %27 = vector.load %arg4[%c0_11, %c0_12] : memref<128x128xbf16, #tpu.memory_space<vmem>>, vector<128x128xbf16>
    %cst_13 = arith.constant dense<0.000000e+00> : vector<1x128xf32>
    %28 = tpu.matmul %26, %27, %cst_13 {dimension_numbers = #tpu.dot_dimension_numbers<[1], [0], [0], [1], [0, 0, 1, 1], [], []>} : vector<1x128xbf16>, vector<128x128xbf16>, vector<1x128xf32> -> vector<1x128xf32>
    %29 = arith.addf %28, %8 : vector<1x128xf32>
    %cst_14 = arith.constant 0.000000e+00 : f32
    %30 = vector.broadcast %cst_14 : f32 to vector<1x128xf32>
    %31 = arith.maximumf %29, %30 : vector<1x128xf32>
    %32 = arith.truncf %31 : vector<1x128xf32> to vector<1x128xbf16>
    %c0_15 = arith.constant 0 : index
    %c0_16 = arith.constant 0 : index
    %33 = vector.load %arg5[%c0_15, %c0_16] : memref<128x128xbf16, #tpu.memory_space<vmem>>, vector<128x128xbf16>
    %cst_17 = arith.constant dense<0.000000e+00> : vector<1x128xf32>
    %34 = tpu.matmul %32, %33, %cst_17 {dimension_numbers = #tpu.dot_dimension_numbers<[1], [0], [0], [1], [0, 0, 1, 1], [], []>} : vector<1x128xbf16>, vector<128x128xbf16>, vector<1x128xf32> -> vector<1x128xf32>
    %35 = arith.addf %34, %7 : vector<1x128xf32>
    %36 = arith.negf %35 : vector<1x128xf32>
    %37 = math.exp %36 : vector<1x128xf32>
    %cst_18 = arith.constant 1.000000e+00 : f32
    %38 = vector.broadcast %cst_18 : f32 to vector<1x128xf32>
    %39 = arith.addf %38, %37 : vector<1x128xf32>
    %40 = arith.divf %38, %39 : vector<1x128xf32>
    %41 = vector.broadcast %40 : vector<1x128xf32> to vector<16x128xf32>
    %42 = arith.mulf %41, %21 : vector<16x128xf32>
    %43 = arith.addf %42, %11 : vector<16x128xf32>
    %cst_19 = arith.constant 0.000000e+00 : f32
    %44 = vector.broadcast %cst_19 : f32 to vector<16x128xf32>
    %45 = arith.maximumf %43, %44 : vector<16x128xf32>
    %46 = arith.truncf %45 : vector<16x128xf32> to vector<16x128xbf16>
    %c0_20 = arith.constant 0 : index
    %c0_21 = arith.constant 0 : index
    %47 = vector.load %arg7[%c0_20, %c0_21] : memref<16x128xbf16, #tpu.memory_space<vmem>>, vector<16x128xbf16>
    tpu.vector_store %arg7[%c0_20, %c0_21], %46 {strides = array<i32>} : memref<16x128xbf16, #tpu.memory_space<vmem>>, vector<16x128xbf16>,
    return
  }
  func.func @transform_0(%arg0: i32) -> (i32, i32) {
    %c0_i32 = arith.constant 0 : i32
    %c0_i32_0 = arith.constant 0 : i32
    return %arg0, %c0_i32 : i32, i32
  }
  func.func @transform_1(%arg0: i32) -> (i32, i32) {
    %c0_i32 = arith.constant 0 : i32
    %c0_i32_0 = arith.constant 0 : i32
    %c0_i32_1 = arith.constant 0 : i32
    return %c0_i32, %c0_i32_0 : i32, i32
  }
  func.func @transform_2(%arg0: i32) -> (i32, i32) {
    %c0_i32 = arith.constant 0 : i32
    %c0_i32_0 = arith.constant 0 : i32
    %c0_i32_1 = arith.constant 0 : i32
    return %c0_i32, %c0_i32_0 : i32, i32
  }
  func.func @transform_3(%arg0: i32) -> (i32, i32) {
    %c0_i32 = arith.constant 0 : i32
    %c0_i32_0 = arith.constant 0 : i32
    %c0_i32_1 = arith.constant 0 : i32
    return %c0_i32, %c0_i32_0 : i32, i32
  }
  func.func @transform_4(%arg0: i32) -> (i32, i32) {
    %c0_i32 = arith.constant 0 : i32
    %c0_i32_0 = arith.constant 0 : i32
    %c0_i32_1 = arith.constant 0 : i32
    return %c0_i32, %c0_i32_0 : i32, i32
  }
  func.func @transform_5(%arg0: i32) -> (i32, i32) {
    %c0_i32 = arith.constant 0 : i32
    %c0_i32_0 = arith.constant 0 : i32
    %c0_i32_1 = arith.constant 0 : i32
    return %c0_i32, %c0_i32_0 : i32, i32
  }
  func.func @transform_6(%arg0: i32) -> (i32, i32) {
    %c0_i32 = arith.constant 0 : i32
    %c0_i32_0 = arith.constant 0 : i32
    return %arg0, %c0_i32 : i32, i32
  }
}

module attributes {stable_mosaic.version = 11 : i64} {
  func.func @_basic_block_kernel(%arg0: i32, %arg1: memref<16x16xbf16, #tpu.memory_space<vmem>>, %arg2: memref<16x256xbf16, #tpu.memory_space<vmem>>, %arg3: memref<128x128xbf16, #tpu.memory_space<vmem>>, %arg4: memref<128x128xbf16, #tpu.memory_space<vmem>>, %arg5: memref<128x128xbf16, #tpu.memory_space<vmem>>, %arg6: memref<8x128xf32, #tpu.memory_space<vmem>>, %arg7: memref<16x128xbf16, #tpu.memory_space<vmem>>) attributes {dimension_semantics = [#tpu.dimension_semantics<parallel>], iteration_bounds = array<i64: 2>, scalar_prefetch = 0 : i64, scratch_operands = 0 : i64, tpu.core_type = #tpu.core_type<tc>, window_params = [{transform_indices = @transform_0, window_bounds = array<i64: 16, 16>}, {pipeline_mode = #tpu.pipeline_mode<synchronous>, transform_indices = @transform_1, window_bounds = array<i64: 16, 256>}, {pipeline_mode = #tpu.pipeline_mode<synchronous>, transform_indices = @transform_2, window_bounds = array<i64: 128, 128>}, {pipeline_mode = #tpu.pipeline_mode<synchronous>, transform_indices = @transform_3, window_bounds = array<i64: 128, 128>}, {pipeline_mode = #tpu.pipeline_mode<synchronous>, transform_indices = @transform_4, window_bounds = array<i64: 128, 128>}, {pipeline_mode = #tpu.pipeline_mode<synchronous>, transform_indices = @transform_5, window_bounds = array<i64: 8, 128>}, {transform_indices = @transform_6, window_bounds = array<i64: 16, 128>}]} {
    %c0 = arith.constant 0 : index
    %c0_0 = arith.constant 0 : index
    %0 = vector.load %arg1[%c0, %c0_0] : memref<16x16xbf16, #tpu.memory_space<vmem>>, vector<16x16xbf16>
    %c0_1 = arith.constant 0 : index
    %c0_2 = arith.constant 0 : index
    %1 = vector.load %arg2[%c0_1, %c0_2] : memref<16x256xbf16, #tpu.memory_space<vmem>>, vector<16x256xbf16>
    %cst = arith.constant dense<0.000000e+00> : vector<16x256xf32>
    %2 = tpu.matmul %0, %1, %cst {dimension_numbers = #tpu.dot_dimension_numbers<[1], [0], [0], [1], [0, 0, 1, 1], [], []>} : vector<16x16xbf16>, vector<16x256xbf16>, vector<16x256xf32> -> vector<16x256xf32>
    %c0_3 = arith.constant 0 : index
    %c0_4 = arith.constant 0 : index
    %3 = vector.load %arg6[%c0_3, %c0_4] : memref<8x128xf32, #tpu.memory_space<vmem>>, vector<8x128xf32>
    %4 = vector.extract_strided_slice %3 {offsets = [0, 0], sizes = [1, 128], strides = [1, 1]} : vector<8x128xf32> to vector<1x128xf32>
    %5 = vector.extract_strided_slice %3 {offsets = [1, 0], sizes = [1, 128], strides = [1, 1]} : vector<8x128xf32> to vector<1x128xf32>
    %6 = vector.extract_strided_slice %3 {offsets = [2, 0], sizes = [1, 128], strides = [1, 1]} : vector<8x128xf32> to vector<1x128xf32>
    %7 = vector.extract_strided_slice %3 {offsets = [3, 0], sizes = [1, 128], strides = [1, 1]} : vector<8x128xf32> to vector<1x128xf32>
    %8 = vector.extract_strided_slice %3 {offsets = [4, 0], sizes = [1, 128], strides = [1, 1]} : vector<8x128xf32> to vector<1x128xf32>
    %9 = vector.extract_strided_slice %2 {offsets = [0, 128], sizes = [16, 128], strides = [1, 1]} : vector<16x256xf32> to vector<16x128xf32>
    %10 = vector.broadcast %6 : vector<1x128xf32> to vector<16x128xf32>
    %11 = arith.addf %9, %10 : vector<16x128xf32>
    %12 = vector.extract_strided_slice %2 {offsets = [0, 0], sizes = [16, 128], strides = [1, 1]} : vector<16x256xf32> to vector<16x128xf32>
    %13 = vector.broadcast %4 : vector<1x128xf32> to vector<16x128xf32>
    %14 = arith.addf %12, %13 : vector<16x128xf32>
    %cst_5 = arith.constant 0.000000e+00 : f32
    %15 = vector.broadcast %cst_5 : f32 to vector<16x128xf32>
    %16 = arith.maximumf %14, %15 : vector<16x128xf32>
    %17 = arith.truncf %16 : vector<16x128xf32> to vector<16x128xbf16>
    %c0_6 = arith.constant 0 : index
    %c0_7 = arith.constant 0 : index
    %18 = vector.load %arg3[%c0_6, %c0_7] : memref<128x128xbf16, #tpu.memory_space<vmem>>, vector<128x128xbf16>
    %cst_8 = arith.constant dense<0.000000e+00> : vector<16x128xf32>
    %19 = tpu.matmul %17, %18, %cst_8 {dimension_numbers = #tpu.dot_dimension_numbers<[1], [0], [0], [1], [0, 0, 1, 1], [], []>} : vector<16x128xbf16>, vector<128x128xbf16>, vector<16x128xf32> -> vector<16x128xf32>
    %20 = vector.broadcast %5 : vector<1x128xf32> to vector<16x128xf32>
    %21 = arith.addf %19, %20 : vector<16x128xf32>
    %cst_9 = arith.constant dense<0.000000e+00> : vector<128xf32>
    %22 = vector.multi_reduction <add>, %21, %cst_9 [0] : vector<16x128xf32> to vector<128xf32>
    %23 = vector.shape_cast %22 : vector<128xf32> to vector<1x128xf32>
    %cst_10 = arith.constant 1.600000e+01 : f32
    %24 = vector.broadcast %cst_10 : f32 to vector<1x128xf32>
    %25 = arith.divf %23, %24 : vector<1x128xf32>
    %26 = arith.truncf %25 : vector<1x128xf32> to vector<1x128xbf16>
    %c0_11 = arith.constant 0 : index
    %c0_12 = arith.constant 0 : index
    %27 = vector.load %arg4[%c0_11, %c0_12] : memref<128x128xbf16, #tpu.memory_space<vmem>>, vector<128x128xbf16>
    %cst_13 = arith.constant dense<0.000000e+00> : vector<1x128xf32>
    %28 = tpu.matmul %26, %27, %cst_13 {dimension_numbers = #tpu.dot_dimension_numbers<[1], [0], [0], [1], [0, 0, 1, 1], [], []>} : vector<1x128xbf16>, vector<128x128xbf16>, vector<1x128xf32> -> vector<1x128xf32>
    %29 = arith.addf %28, %8 : vector<1x128xf32>
    %cst_14 = arith.constant 0.000000e+00 : f32
    %30 = vector.broadcast %cst_14 : f32 to vector<1x128xf32>
    %31 = arith.maximumf %29, %30 : vector<1x128xf32>
    %32 = arith.truncf %31 : vector<1x128xf32> to vector<1x128xbf16>
    %c0_15 = arith.constant 0 : index
    %c0_16 = arith.constant 0 : index
    %33 = vector.load %arg5[%c0_15, %c0_16] : memref<128x128xbf16, #tpu.memory_space<vmem>>, vector<128x128xbf16>
    %cst_17 = arith.constant dense<0.000000e+00> : vector<1x128xf32>
    %34 = tpu.matmul %32, %33, %cst_17 {dimension_numbers = #tpu.dot_dimension_numbers<[1], [0], [0], [1], [0, 0, 1, 1], [], []>} : vector<1x128xbf16>, vector<128x128xbf16>, vector<1x128xf32> -> vector<1x128xf32>
    %35 = arith.addf %34, %7 : vector<1x128xf32>
    %36 = arith.negf %35 : vector<1x128xf32>
    %37 = math.exp %36 : vector<1x128xf32>
    %cst_18 = arith.constant 1.000000e+00 : f32
    %38 = vector.broadcast %cst_18 : f32 to vector<1x128xf32>
    %39 = arith.addf %38, %37 : vector<1x128xf32>
    %40 = arith.divf %38, %39 : vector<1x128xf32>
    %41 = vector.broadcast %40 : vector<1x128xf32> to vector<16x128xf32>
    %42 = arith.mulf %41, %21 : vector<16x128xf32>
    %43 = arith.addf %42, %11 : vector<16x128xf32>
    %cst_19 = arith.constant 0.000000e+00 : f32
    %44 = vector.broadcast %cst_19 : f32 to vector<16x128xf32>
    %45 = arith.maximumf %43, %44 : vector<16x128xf32>
    %46 = arith.truncf %45 : vector<16x128xf32> to vector<16x128xbf16>
    %c0_20 = arith.constant 0 : index
    %c0_21 = arith.constant 0 : index
    %47 = vector.load %arg7[%c0_20, %c0_21] : memref<16x128xbf16, #tpu.memory_space<vmem>>, vector<16x128xbf16>
    tpu.vector_store %arg7[%c0_20, %c0_21], %46 {strides = array<i32>} : memref<16x128xbf16, #tpu.memory_space<vmem>>, vector<16x128xbf16>,
    return
  }
  func.func @transform_0(%arg0: i32) -> (i32, i32) {
    %c0_i32 = arith.constant 0 : i32
    %c0_i32_0 = arith.constant 0 : i32
    return %arg0, %c0_i32 : i32, i32
  }
  func.func @transform_1(%arg0: i32) -> (i32, i32) {
    %c0_i32 = arith.constant 0 : i32
    %c0_i32_0 = arith.constant 0 : i32
    %c0_i32_1 = arith.constant 0 : i32
    return %c0_i32, %c0_i32_0 : i32, i32
  }
  func.func @transform_2(%arg0: i32) -> (i32, i32) {
    %c0_i32 = arith.constant 0 : i32
    %c0_i32_0 = arith.constant 0 : i32
    %c0_i32_1 = arith.constant 0 : i32
    return %c0_i32, %c0_i32_0 : i32, i32
  }
  func.func @transform_3(%arg0: i32) -> (i32, i32) {
    %c0_i32 = arith.constant 0 : i32
    %c0_i32_0 = arith.constant 0 : i32
    %c0_i32_1 = arith.constant 0 : i32
    return %c0_i32, %c0_i32_0 : i32, i32
  }
  func.func @transform_4(%arg0: i32) -> (i32, i32) {
    %c0_i32 = arith.constant 0 : i32
    %c0_i32_0 = arith.constant 0 : i32
    %c0_i32_1 = arith.constant 0 : i32
    return %c0_i32, %c0_i32_0 : i32, i32
  }
  func.func @transform_5(%arg0: i32) -> (i32, i32) {
    %c0_i32 = arith.constant 0 : i32
    %c0_i32_0 = arith.constant 0 : i32
    %c0_i32_1 = arith.constant 0 : i32
    return %c0_i32, %c0_i32_0 : i32, i32
  }
  func.func @transform_6(%arg0: i32) -> (i32, i32) {
    %c0_i32 = arith.constant 0 : i32
    %c0_i32_0 = arith.constant 0 : i32
    return %arg0, %c0_i32 : i32, i32
  }
}

</mosaic_0001>

<bundles_post_ra>
// kernel: tpu_custom_call.1
= control target key start
LH: loop header
LB: loop body
LE: loop exit
PB: predicated region body
PF: predicated region fallthrough
CT: control target
= control target key end

     0   :  { %11 = vsyncpa [#allocation3], 0  ;;  %s1506_s0 = inlined_call_operand.vmem [shape: bf16[32,16], index: 0, kind: input, shape index: {}]   ;;  %s1507_s1 = inlined_call_operand.vmem [shape: bf16[16,256], index: 1, kind: input, shape index: {}]   ;;  %s1508_s2 = inlined_call_operand.hbm [shape: bf16[128,128], index: 2, kind: input, shape index: {}]   ;;  %s1509_s3 = inlined_call_operand.hbm [shape: bf16[128,128], index: 3, kind: input, shape index: {}]   ;;  %s1510_s4 = inlined_call_operand.hbm [shape: bf16[128,128], index: 4, kind: input, shape index: {}]   ;;  %s1511_s5 = inlined_call_operand.vmem [shape: f32[8,128], index: 5, kind: input, shape index: {}]   ;;  %s1512_s6 = inlined_call_operand.hbm [shape: bf16[32,128], index: 6, kind: output, shape index: {}]  }
   0x1   :  { %12 = vsyncpa [#allocation6], 0 }
   0x2   :  { %13 = vsyncpa [#allocation4], 0 }
   0x3   :  { %15 = vsyncpa [#allocation4 + $0x1], 0  ;;  %s1294_s21 = smov 0   ;;  %s1296_s22 = smov 0  }
   0x4   :  { %s1298_s23 = smov 0   ;;  %s1300_s24 = smov 0  }
   0x5 LB: > { %s1315_s25 = sadd.s32 4294967295, %s1246_s24   ;;  %s847_s26 = sadd.s32 4294967294, %s1246_s24   ;;  %s1246_s24 = sphi %s1300_s24, %s1528_s24   ;;  %s1242_s23 = sphi %s1298_s23, %s1527_s23   ;;  %s1238_s22 = sphi %s1296_s22, %s1526_s22   ;;  %s1234_s21 = sphi %s1294_s21, %s1525_s21  }
   0x6   : > { %s1319_s27 = sadd.s32 1, %s1246_s24   ;;  %s159_s28 = sadd.s32 1, %s1242_s23 }
   0x7   : > { %s156_s29 = ssub.s32 %s1246_s24, %s1319_s27  ;;  %p169_p0 = scmp.ne.s32.totalorder %s1242_s23, %s1238_s22 }
   0x8   : > { %p157_p1 = scmp.eq.s32.totalorder %s156_s29, 0  ;;  %p170_p2 = scmp.eq.s32.totalorder %s1315_s25, 1 }
   0x9   : > { %p175_p3 = scmp.ne.s32.totalorder %s1238_s22, %s1234_s21  ;;  %p176_p4 = scmp.eq.s32.totalorder %s847_s26, 1 }
   0xa   : > { %s1330_s30 = scalar_select %p157_p1, %s1242_s23, %s159_s28  }
   0xb   : > { %p1332_p5 = por %p170_p2, %p169_p0  ;;  %p1336_p6 = por %p176_p4, %p175_p3 }
   0xc   : > { %p848_p7 = scmp.ge.s32.totalorder %s1246_s24, 1  ;;  %p183_p8 = scmp.lt.s32.totalorder %s1246_s24, 3 }
   0xd   : > { %s1515_s7 = scalar_select %p1332_p5, 1, 0 }
   0xe   : > { %s1516_s8 = scalar_select %p1336_p6, 1, 0 }
   0xf   : > { %p1513_p9 = scmp.eq.s32.totalorder %s1315_s25, 0  ;;  %p1343_p10 = pnand %p848_p7, %p183_p8 }
  0x10   : > { %s1248_s10 = smov [#allocation5]   ;;  %s1249_s13 = smov [#allocation2]  }
  0x11   : > { %p1005_p11 = pneg %p1343_p10  ;;  %s211_s11 = sshll.u32 %s1248_s10, 4  ;;  %s212_s11 = int_to_ptr.vmem [resolvable:$true] %s211_s11 }
  0x12   : > { %s198_s14 = sshll.u32 %s1249_s13, 4  ;;  %s1250_s15 = smov [#allocation7]   ;;  %s199_s14 = int_to_ptr.vmem [resolvable:$true] %s198_s14 }
  0x13   : > { %p1351_p12 = pnand %p1513_p9, %p1005_p11  ;;  %s224_s16 = sshll.u32 %s1250_s15, 4  ;;  %s225_s16 = int_to_ptr.vmem [resolvable:$true] %s224_s16 }
  0x14   : > { %s1111_s17 = scalar_lea.vmem %s212_s11, 1024  ;;  %p1119_p3 = scmp.lt.s32.totalorder %s212_s11, %s212_s11 }
  0x15   : > { %p1102_p13 = pneg %p1351_p12  ;;  %p1112_p0 = scmp.ne.s32.totalorder %s212_s11, %s1111_s17 }
  0x16   : > { %p1120_p4 = scmp.lt.s32.totalorder %s1111_s17, %s1111_s17 }
  0x17   : > { %p1114_p1 = pnand %p1112_p0, %p1102_p13 }
  0x18   : > { %p1121_p7 = por %p1120_p4, %p1119_p3 }
  0x19   : > { %p1115_p2 = pneg %p1114_p1 }
  0x1b   : > { %p1122_p8 = pnand %p1121_p7, %p1115_p2 }
  0x1d   : > { %1125 = shalt.err (!%p1122_p8)
}
  0x1e   : > { %s1251_s18 = smov 64   ;;  %s1252_s19 = smov 4  }
  0x1f   : > { %1011 = dma.hbm_to_vmem [thread:$0]  (!%p1351_p12), %s1509_s3, 1024, %s212_s11, [#allocation6], %s1251_s18, %s1251_s18, %s1252_s19  }
  0x20   : > { %s1137_s28 = scalar_lea.vmem %s199_s14, 1024  ;;  %p1145_p9 = scmp.lt.s32.totalorder %s199_s14, %s199_s14 }
  0x21   : > { %p1138_p11 = scmp.ne.s32.totalorder %s199_s14, %s1137_s28  ;;  %p1146_p6 = scmp.lt.s32.totalorder %s1137_s28, %s1137_s28 }
  0x23   : > { %p1140_p0 = pnand %p1138_p11, %p1102_p13  ;;  %p1147_p3 = por %p1146_p6, %p1145_p9 }
  0x25   : > { %p1141_p1 = pneg %p1140_p0 }
  0x27   : > { %p1148_p2 = pnand %p1147_p3, %p1141_p1 }
  0x29   : > { %1151 = shalt.err (!%p1148_p2)
}
  0x2a   : > { %1008 = dma.hbm_to_vmem [thread:$0]  (!%p1351_p12), %s1508_s2, 1024, %s199_s14, [#allocation3], %s1251_s18, %s1251_s18, %s1252_s19  }
  0x2b   : > { %s1163_s11 = scalar_lea.vmem %s225_s16, 1024  ;;  %p1171_p11 = scmp.lt.s32.totalorder %s225_s16, %s225_s16 }
  0x2c   : > { %p1164_p4 = scmp.ne.s32.totalorder %s225_s16, %s1163_s11  ;;  %p1172_p0 = scmp.lt.s32.totalorder %s1163_s11, %s1163_s11 }
  0x2e   : > { %p1166_p7 = pnand %p1164_p4, %p1102_p13  ;;  %p1173_p5 = por %p1172_p0, %p1171_p11 }
  0x30   : > { %p1167_p8 = pneg %p1166_p7 }
  0x32   : > { %p1174_p6 = pnand %p1173_p5, %p1167_p8 }
  0x34   : > { %1177 = shalt.err (!%p1174_p6)
}
  0x35   : > { %1014 = dma.hbm_to_vmem [thread:$0]  (!%p1351_p12), %s1510_s4, 1024, %s225_s16, [#allocation6], %s1251_s18, %s1251_s18, %s1252_s19  }
  0x36   : > { %252 = sbr.rel (%p1343_p10) target bundleno = 940 (0x3ac), region = 44  ;;  %p1519_p9 = scmp.eq.s32.totalorder (!%p1343_p10), %s1315_s25, 0 }
  0x3b   : > { %1221 = dma.done.wait (%p1519_p9), [#allocation3], 1024   ;;  %p1520_p13 = pmov %p1519_p9 }
  0x3c   : > { %p1521_p1 = pmov %p1519_p9 }
  0x3d   : > { %1223 = vsyncadd (%p1520_p13), [#allocation3], 4294966272 }
  0x3e   : > { %1225 = dma.done.wait (%p1521_p1), [#allocation6], 2048   ;;  %p1522_p5 = pmov %p1521_p1 }
  0x3f   : > { %s858_s12 = sshll.u32 %s1315_s25, 1  ;;  %v1253_v0 = vmov 0   ;;  %v1254_v1 = vmov 0.0   ;;  %v1068_v2 = vld [vmem:[%s1507_s1 + $0x4] ss:$8 sps:$4 sm:$0xff]   ;;  %vm317_vm0 = vcmask 130048   ;;  %v365_v15 = vlaneseq }
  0x40   : > { %1227 = vsyncadd (%p1522_p5), [#allocation6], 4294965248  ;;  %353 = vmatprep.mubr.bf16.mxu0 %v1253_v0  ;;  %p291_p12 = scmp.lt.s32.totalorder %s858_s12, 3  ;;  %931 = vmatprep.subr.bf16.mxu1 %v1254_v1  ;;  %v1070_v3 = vld [vmem:[%s1507_s1] ss:$8 sps:$4 sm:$0xff]   ;;  %v1072_v5 = vld [vmem:[#allocation2 + $0x38] sm:$0xff]  }
  0x41   : > { %335 = vmatprep.subr.bf16.mxu0 %v1068_v2  ;;  %932 = vmatpush3.bf16.msra.mxu1 %v1072_v5  ;;  %v1073_v6 = vld [vmem:[#allocation2 + $0x30] sm:$0xff]   ;;  %v1074_v7 = vld [vmem:[#allocation2 + $0x28] sm:$0xff]   ;;  %v1075_v8 = vld [vmem:[#allocation2 + $0x20] sm:$0xff]   ;;  %vm1255_vm1 = vmmov 0   ;;  %v1417_v16 = vshrl.u32 %v365_v15, 7  ;;  %s287_s10 = sand.u32 1, %s1238_s22  }
  0x42   : > { %s1530_s12 = smov (!%p291_p12, %s858_s12), 3  ;;  %336 = vmatpush1.bf16.msra.mxu0 %v1070_v3  ;;  %933 = vmatprep.subr.bf16.mxu1 %v1254_v1  ;;  %v1076_v9 = vld [vmem:[#allocation2 + $0x18] sm:$0xff]   ;;  %v1077_v10 = vld [vmem:[#allocation2 + $0x10] sm:$0xff]   ;;  %v1078_v11 = vld [vmem:[#allocation2 + $0x8] sm:$0xff]   ;;  %s857_s11 = sshll.u32 %s287_s10, 3 }
  0x43   : > { %s859_s9 = sshll.u32 %s1530_s12, 2  ;;  %951 = vmatprep.subr.bf16.mxu0 %v1254_v1  ;;  %v1079_v12 = vld [vmem:[#allocation2] sm:$0xff]   ;;  %947 = vmatprep.mubr.msk.bf16.mxu1 %vm1255_vm1, %v1254_v1  ;;  %v1080_v13 = vld [vmem:[#allocation5 + $0x38] sm:$0xff]   ;;  %v1081_v14 = vld [vmem:[#allocation5 + $0x30] sm:$0xff]   ;;  %v373_v17 = vsub.s32 0, %v1417_v16  ;;  %v367_v18 = vsub.s32 2, %v1417_v16 }
  0x44   : > { %s294_s17 = scalar_lea.vmem %s1506_s0, %s859_s9  ;;  %v1424_v19 = vld [vmem:[%s1511_s5] sm:$0xff]  ;;  %v1082_v31 = vld [vmem:[#allocation5 + $0x28] sm:$0xff]   ;;  %v1084_v33 = vld [vmem:[#allocation5 + $0x18] sm:$0xff]   ;;  %v398_v43 = vsub.s32 1, %v1417_v16  ;;  %s898_s13 = sshll.u32 %s1315_s25, 7 }
  0x45   : > { %v1071_v4 = vld [vmem:[%s294_s17] sm:$0xff]   ;;  %934 = vmatpush3.bf16.msra.mxu1 %v1073_v6  ;;  %v374_v20 = vrot.slane %v1424_v19, %v373_v17  ;;  %v1430_v21 = vrot.slane %v1424_v19, %v367_v18  ;;  %v1085_v34 = vld [vmem:[#allocation5 + $0x10] sm:$0xff]   ;;  %v1086_v35 = vld [vmem:[#allocation5 + $0x8] sm:$0xff]   ;;  %v564_v62 = vrot.slane %v1424_v19, 4  ;;  %s289_s15 = scalar_lea.vmem [#allocation8], %s857_s11  ;;  %s1462_s16 = scalar_lea.hbm %s1512_s6, %s898_s13 }
  0x46   : > { %863 = vmatmul.mubr.msk.bf16.vlgmr.msra.gmra.mxu0 %vm317_vm0, %v1071_v4  ;;  %935 = vmatprep.subr.bf16.mxu1 %v1254_v1  ;;  %v1083_v32 = vld [vmem:[#allocation5 + $0x20] sm:$0xff]   ;;  %v1088_v37 = vld [vmem:[#allocation7 + $0x38] sm:$0xff]   ;;  %v1089_v38 = vld [vmem:[#allocation7 + $0x30] sm:$0xff]   ;;  %v399_v45 = vrot.slane %v1424_v19, %v398_v43  ;;  %s754_s12 = sshll.u32 %s289_s15, 4  ;;  %s1466_s17 = scalar_lea.sflag [#allocation4], %s287_s10  ;;  %s1464_s12 = int_to_ptr.vmem [resolvable:$true] %s754_s12 }
  0x47   : > { %967 = vmatprep.mubr.msk.bf16.mxu0 %vm1255_vm1, %v1254_v1  ;;  %952 = vmatpush3.bf16.msra.mxu0 %v1080_v13  ;;  %v1087_v36 = vld [vmem:[#allocation5] sm:$0xff]   ;;  %v1090_v39 = vld [vmem:[#allocation7 + $0x28] sm:$0xff]   ;;  %v1092_v41 = vld [vmem:[#allocation7 + $0x18] sm:$0xff]   ;;  %s1178_s18 = scalar_lea.vmem %s1464_s12, 128  ;;  %p1523_p3 = scmp.ne.s32.totalorder %s1515_s7, 0 }
  0x48   : > { %953 = vmatprep.subr.bf16.mxu0 %v1254_v1  ;;  %v1091_v40 = vld [vmem:[#allocation7 + $0x20] sm:$0xff]   ;;  %v1093_v42 = vld [vmem:[#allocation7 + $0x10] sm:$0xff]   ;;  %v1094_v60 = vld [vmem:[#allocation7 + $0x8] sm:$0xff]   ;;  %p1179_p10 = scmp.ne.s32.totalorder %s1464_s12, %s1178_s18  ;;  %s1256_s25 = smov [#allocation8]  }
  0x49   : > { %936 = vmatpush3.bf16.msra.mxu1 %v1074_v7  ;;  %v1095_v61 = vld [vmem:[#allocation7] sm:$0xff]   ;;  %s1182_s19 = sshll.u32 %s1256_s25, 4  ;;  %s1183_s19 = int_to_ptr.vmem [resolvable:$false] %s1182_s19 }
  0x4a   : > { %937 = vmatprep.subr.bf16.mxu1 %v1254_v1  ;;  %p1180_p2 = pnand %p1179_p10, %p1523_p3  ;;  %s1184_s20 = scalar_lea.vmem %s1183_s19, 256 }
  0x4b   : > { %954 = vmatpush3.bf16.msra.mxu0 %v1081_v14  ;;  %p1185_p7 = scmp.lt.s32.totalorder %s1464_s12, %s1183_s19  ;;  %p1186_p8 = scmp.lt.s32.totalorder %s1184_s20, %s1178_s18 }
  0x4c   : > { %955 = vmatprep.subr.bf16.mxu0 %v1254_v1  ;;  %p1181_p4 = pneg %p1180_p2 }
  0x4d   : > { %938 = vmatpush3.bf16.msra.mxu1 %v1075_v8  ;;  %v672_v8 = vrot.slane %v1424_v19, 3  ;;  %p1187_p11 = por %p1186_p8, %p1185_p7 }
  0x4e   : > { %939 = vmatprep.subr.bf16.mxu1 %v1254_v1 }
  0x4f   : > { %956 = vmatpush3.bf16.msra.mxu0 %v1082_v31  ;;  %p1188_p0 = pnand %p1187_p11, %p1181_p4 }
  0x50   : > { %957 = vmatprep.subr.bf16.mxu0 %v1254_v1 }
  0x51   : > { %940 = vmatpush3.bf16.msra.mxu1 %v1076_v9 }
  0x52   : > { %941 = vmatprep.subr.bf16.mxu1 %v1254_v1 }
  0x53   : > { %958 = vmatpush3.bf16.msra.mxu0 %v1083_v32 }
  0x54   : > { %959 = vmatprep.subr.bf16.mxu0 %v1254_v1 }
  0x55   : > { %942 = vmatpush3.bf16.msra.mxu1 %v1077_v10 }
  0x56   : > { %943 = vmatprep.subr.bf16.mxu1 %v1254_v1 }
  0x57   : > { %960 = vmatpush3.bf16.msra.mxu0 %v1084_v33 }
  0x58   : > { %961 = vmatprep.subr.bf16.mxu0 %v1254_v1 }
  0x59   : > { %944 = vmatpush3.bf16.msra.mxu1 %v1078_v11 }
  0x5a   : > { %945 = vmatprep.subr.bf16.mxu1 %v1254_v1 }
  0x5b   : > { %962 = vmatpush3.bf16.msra.mxu0 %v1085_v34 }
  0x5c   : > { %963 = vmatprep.subr.bf16.mxu0 %v1254_v1 }
  0x5d   : > { %946 = vmatpush3.bf16.msra.mxu1 %v1079_v12 }
  0x5e   : > { %971 = vmatprep.subr.bf16.mxu1 %v1254_v1 }
  0x5f   : > { %964 = vmatpush3.bf16.msra.mxu0 %v1086_v35 }
  0x60   : > { %965 = vmatprep.subr.bf16.mxu0 %v1254_v1 }
  0x63   : > { %966 = vmatpush3.bf16.msra.mxu0 %v1087_v36 }
 0x106   : > { %v355_v22 = vpop.f32.mrf.mxu0 }
 0x107   : > { %v375_v24 = vadd.f32 %v374_v20, %v355_v22 }
 0x108   : > { %v357_v23 = vpop.f32.mrf.mxu0 }
 0x109   : > { %v1433_v25 = vadd.f32 %v1430_v21, %v357_v23  ;;  %v377_v28 = vmax.f32 %v375_v24, 0.0 }
 0x10a   : > { %v359_v26 = vpop.f32.mrf.mxu0 }
 0x10b   : > { %v376_v27 = vadd.f32 %v374_v20, %v359_v26 }
 0x10c   : > { %v361_v63 = vpop.f32.mrf.mxu0 }
 0x10d   : > { %v378_v29 = vmax.f32 %v376_v27, 0.0  ;;  %v370_v22 = vadd.f32 %v1430_v21, %v361_v63 }
 0x10f   : > { %v379_v30 = vpack.c.bf16 %v378_v29, %v377_v28 }
 0x111   : > { %948 = vmatmul.mubr.bf16.vlgmr.msra.gmra.mxu1 %v379_v30 }
 0x112   : > { %987 = vmatprep.mubr.msk.bf16.mxu1 %vm1255_vm1, %v1254_v1  ;;  %972 = vmatpush3.bf16.msra.mxu1 %v1088_v37 }
 0x113   : > { %973 = vmatprep.subr.bf16.mxu1 %v1254_v1 }
 0x116   : > { %974 = vmatpush3.bf16.msra.mxu1 %v1089_v38 }
 0x117   : > { %975 = vmatprep.subr.bf16.mxu1 %v1254_v1 }
 0x11a   : > { %976 = vmatpush3.bf16.msra.mxu1 %v1090_v39 }
 0x11b   : > { %977 = vmatprep.subr.bf16.mxu1 %v1254_v1 }
 0x11e   : > { %978 = vmatpush3.bf16.msra.mxu1 %v1091_v40 }
 0x11f   : > { %979 = vmatprep.subr.bf16.mxu1 %v1254_v1 }
 0x122   : > { %980 = vmatpush3.bf16.msra.mxu1 %v1092_v41 }
 0x123   : > { %981 = vmatprep.subr.bf16.mxu1 %v1254_v1 }
 0x126   : > { %982 = vmatpush3.bf16.msra.mxu1 %v1093_v42 }
 0x127   : > { %983 = vmatprep.subr.bf16.mxu1 %v1254_v1 }
 0x12a   : > { %984 = vmatpush3.bf16.msra.mxu1 %v1094_v60 }
 0x12b   : > { %985 = vmatprep.subr.bf16.mxu1 %v1254_v1 }
 0x12e   : > { %986 = vmatpush3.bf16.msra.mxu1 %v1095_v61 }
 0x1d1   : > { %v482_v44 = vpop.f32.mrf.mxu1 }
 0x1d2   : > { %v483_v48 = vadd.f32 %v482_v44, %v399_v45 }
 0x1d3   : > { %v949_v46 = vpop.f32.mrf.mxu1 }
 0x1d5   : > { %v485_v47 = vpop.f32.mrf.mxu1 }
 0x1d6   : > { %v486_v49 = vadd.f32 %v485_v47, %v399_v45 }
 0x1d7   : > { %v950_v50 = vpop.f32.mrf.mxu1 }
 0x1d8   : > { %v489_v51 = vadd.f32 %v486_v49, %v483_v48 }
 0x1da   : > { %v490_v52 = vrot.slane %v489_v51, 4 }
 0x1dc   : > { %v491_v53 = vadd.f32 %v490_v52, %v489_v51 }
 0x1de   : > { %v492_v54 = vrot.slane %v491_v53, 2 }
 0x1e0   : > { %v493_v55 = vadd.f32 %v492_v54, %v491_v53 }
 0x1e2   : > { %v494_v56 = vrot.slane %v493_v55, 1 }
 0x1e4   : > { %v495_v57 = vadd.f32 %v494_v56, %v493_v55 }
 0x1e6   : > { %v497_v58 = vmul.f32 0.0625, %v495_v57 }
 0x1e8   : > { %v498_v59 = vpack.c.bf16 %v497_v58, %v497_v58 }
 0x1ea   : > { %968 = vmatmul.mubr.bf16.vlgmr.msra.gmra.mxu0 %v498_v59 }
 0x2aa   : > { %v600_v0 = vpop.f32.mrf.mxu0 }
 0x2ab   : > { %v601_v2 = vadd.f32 %v600_v0, %v564_v62 }
 0x2ac   : > { %v969_v3 = vpop.f32.mrf.mxu0 }
 0x2ad   : > { %v606_v4 = vmax.f32 %v601_v2, 0.0 }
 0x2ae   : > { %v603_v5 = vpop.f32.mrf.mxu0 }
 0x2af   : > { %v607_v6 = vpack.c.bf16 %v606_v4, %v606_v4 }
 0x2b0   : > { %v970_v7 = vpop.f32.mrf.mxu0 }
 0x2b1   : > { %988 = vmatmul.mubr.bf16.vlgmr.msra.gmra.mxu1 %v607_v6 }
 0x371   : > { %v708_v9 = vpop.f32.mrf.mxu1 }
 0x372   : > { %v709_v10 = vadd.f32 %v708_v9, %v672_v8 }
 0x373   : > { %v989_v11 = vpop.f32.mrf.mxu1 }
 0x374   : > { %v888_v1 = vmul.f32 -1.442695, %v709_v10 }
 0x375   : > { %v711_v12 = vpop.f32.mrf.mxu1 }
 0x376   : > { %1096 = vpow2.f32 %v888_v1 }
 0x377   : > { %v990_v13 = vpop.f32.mrf.mxu1 }
 0x383   : > { %v1097_v14 = vpop.eup %1096 }
 0x384   : > { %v717_v15 = vadd.f32 1.0, %v1097_v14 }
 0x386   : > { %1098 = vrcp.f32 %v717_v15 }
 0x393   : > { %v1099_v18 = vpop.eup %1098 }
 0x394   : > { %v723_v20 = vrot.slane %v1099_v18, %v373_v17 }
 0x396   : > { %v724_v19 = vmul.f32 %v723_v20, %v483_v48  ;;  %v725_v23 = vmul.f32 %v723_v20, %v486_v49 }
 0x398   : > { %v726_v24 = vadd.f32 %v724_v19, %v1433_v25  ;;  %v727_v26 = vadd.f32 %v725_v23, %v370_v22 }
 0x39a   : > { %v728_v27 = vmax.f32 %v726_v24, 0.0  ;;  %v729_v28 = vmax.f32 %v727_v26, 0.0 }
 0x39c   : > { %v902_v16 = vpack.c.bf16 %v729_v28, %v728_v27 }
 0x39e   : > { %903 = vst [vmem:[%s289_s15] sm:$0xff] %v902_v16  }
 0x39f   : > { %1191 = shalt.err (!%p1188_p0)
}
 0x3a0   : > { %s1192_s26 = scalar_lea.hbm %s1462_s16, 128  ;;  %s1196_s10 = scalar_lea.hbm %s1512_s6, 256 }
 0x3a1   : > { %p1193_p6 = scmp.ne.s32.totalorder %s1462_s16, %s1192_s26  ;;  %p1197_p1 = scmp.lt.s32.totalorder %s1462_s16, %s1512_s6 }
 0x3a2   : > { %p1198_p5 = scmp.lt.s32.totalorder %s1196_s10, %s1192_s26 }
 0x3a3   : > { %p1194_p9 = pnand %p1193_p6, %p1523_p3 }
 0x3a4   : > { %p1199_p12 = por %p1198_p5, %p1197_p1 }
 0x3a5   : > { %p1195_p13 = pneg %p1194_p9 }
 0x3a7   : > { %p1200_p10 = pnand %p1199_p12, %p1195_p13 }
 0x3a9   : > { %1203 = shalt.err (!%p1200_p10)
}
 0x3aa   : > { %s1257_s15 = smov 64   ;;  %s1258_s9 = smov 4  }
 0x3ab   : > { %1003 = dma.vmem_to_hbm [thread:$0]  (%p1523_p3), %s1464_s12, 128, %s1462_s16, %s1466_s17, %s1257_s15, %s1257_s15, %s1258_s9  }
 0x3ac PF: > { %p1025_p2 = scmp.ge.s32.totalorder %s1246_s24, 2  ;;  %s769_s14 = sand.u32 1, %s1234_s21  }
 0x3ad   : > { %p1524_p4 = scmp.ne.s32.totalorder %s1516_s8, 0  ;;  %s770_s18 = scalar_lea.sflag [#allocation4], %s769_s14 }
 0x3af   : > { %p1016_p7 = pnand %p1025_p2, %p1524_p4 }
 0x3b1   : > { %p1017_p8 = pneg %p1016_p7 }
 0x3b3   : > { %1229 = dma.done.wait (%p1017_p8), %s770_s18, 128  }
 0x3b4   : > { %1231 = vsyncadd (%p1017_p8), %s770_s18, 4294967168  ;;  %p18_p11 = scmp.ge.s32.totalorder %s1319_s27, 4   ;;  %s1525_s21 = smov %s1238_s22 }
 0x3b5   : > { %s1526_s22 = smov %s1242_s23  ;;  %s1527_s23 = smov %s1330_s30 }
 0x3b6   : > { %s1528_s24 = smov %s1319_s27  ;;  %20 = sbr.rel (!%p18_p11) target bundleno = 5 (0x5), region = 92 }
 0x3bb   :  { %775 = vsyncpa [#allocation3], 1 }
 0x3bc   :  { %777 = vsyncpa [#allocation3 + $0x1], 1 }
 0x3bd   :  { %778 = vsyncpa [#allocation6], 1 }
 0x3be   :  { %779 = vsyncpa [#allocation4], 1 }
 0x3bf   :  { %781 = vsyncpa [#allocation4 + $0x1], 1 }

// kernel: tpu_custom_call.1
= control target key start
LH: loop header
LB: loop body
LE: loop exit
PB: predicated region body
PF: predicated region fallthrough
CT: control target
= control target key end

     0   :  { %11 = vsyncpa [#allocation3], 0  ;;  %s1506_s0 = inlined_call_operand.vmem [shape: bf16[32,16], index: 0, kind: input, shape index: {}]   ;;  %s1507_s1 = inlined_call_operand.vmem [shape: bf16[16,256], index: 1, kind: input, shape index: {}]   ;;  %s1508_s2 = inlined_call_operand.hbm [shape: bf16[128,128], index: 2, kind: input, shape index: {}]   ;;  %s1509_s3 = inlined_call_operand.hbm [shape: bf16[128,128], index: 3, kind: input, shape index: {}]   ;;  %s1510_s4 = inlined_call_operand.hbm [shape: bf16[128,128], index: 4, kind: input, shape index: {}]   ;;  %s1511_s5 = inlined_call_operand.vmem [shape: f32[8,128], index: 5, kind: input, shape index: {}]   ;;  %s1512_s6 = inlined_call_operand.hbm [shape: bf16[32,128], index: 6, kind: output, shape index: {}]  }
   0x1   :  { %12 = vsyncpa [#allocation6], 0 }
   0x2   :  { %13 = vsyncpa [#allocation4], 0 }
   0x3   :  { %15 = vsyncpa [#allocation4 + $0x1], 0  ;;  %s1294_s21 = smov 0   ;;  %s1296_s22 = smov 0  }
   0x4   :  { %s1298_s23 = smov 0   ;;  %s1300_s24 = smov 0  }
   0x5 LB: > { %s1315_s25 = sadd.s32 4294967295, %s1246_s24   ;;  %s847_s26 = sadd.s32 4294967294, %s1246_s24   ;;  %s1246_s24 = sphi %s1300_s24, %s1528_s24   ;;  %s1242_s23 = sphi %s1298_s23, %s1527_s23   ;;  %s1238_s22 = sphi %s1296_s22, %s1526_s22   ;;  %s1234_s21 = sphi %s1294_s21, %s1525_s21  }
   0x6   : > { %s1319_s27 = sadd.s32 1, %s1246_s24   ;;  %s159_s28 = sadd.s32 1, %s1242_s23 }
   0x7   : > { %s156_s29 = ssub.s32 %s1246_s24, %s1319_s27  ;;  %p169_p0 = scmp.ne.s32.totalorder %s1242_s23, %s1238_s22 }
   0x8   : > { %p157_p1 = scmp.eq.s32.totalorder %s156_s29, 0  ;;  %p170_p2 = scmp.eq.s32.totalorder %s1315_s25, 1 }
   0x9   : > { %p175_p3 = scmp.ne.s32.totalorder %s1238_s22, %s1234_s21  ;;  %p176_p4 = scmp.eq.s32.totalorder %s847_s26, 1 }
   0xa   : > { %s1330_s30 = scalar_select %p157_p1, %s1242_s23, %s159_s28  }
   0xb   : > { %p1332_p5 = por %p170_p2, %p169_p0  ;;  %p1336_p6 = por %p176_p4, %p175_p3 }
   0xc   : > { %p848_p7 = scmp.ge.s32.totalorder %s1246_s24, 1  ;;  %p183_p8 = scmp.lt.s32.totalorder %s1246_s24, 3 }
   0xd   : > { %s1515_s7 = scalar_select %p1332_p5, 1, 0 }
   0xe   : > { %s1516_s8 = scalar_select %p1336_p6, 1, 0 }
   0xf   : > { %p1513_p9 = scmp.eq.s32.totalorder %s1315_s25, 0  ;;  %p1343_p10 = pnand %p848_p7, %p183_p8 }
  0x10   : > { %s1248_s10 = smov [#allocation5]   ;;  %s1249_s13 = smov [#allocation2]  }
  0x11   : > { %p1005_p11 = pneg %p1343_p10  ;;  %s211_s11 = sshll.u32 %s1248_s10, 4  ;;  %s212_s11 = int_to_ptr.vmem [resolvable:$true] %s211_s11 }
  0x12   : > { %s198_s14 = sshll.u32 %s1249_s13, 4  ;;  %s1250_s15 = smov [#allocation7]   ;;  %s199_s14 = int_to_ptr.vmem [resolvable:$true] %s198_s14 }
  0x13   : > { %p1351_p12 = pnand %p1513_p9, %p1005_p11  ;;  %s224_s16 = sshll.u32 %s1250_s15, 4  ;;  %s225_s16 = int_to_ptr.vmem [resolvable:$true] %s224_s16 }
  0x14   : > { %s1111_s17 = scalar_lea.vmem %s212_s11, 1024  ;;  %p1119_p3 = scmp.lt.s32.totalorder %s212_s11, %s212_s11 }
  0x15   : > { %p1102_p13 = pneg %p1351_p12  ;;  %p1112_p0 = scmp.ne.s32.totalorder %s212_s11, %s1111_s17 }
  0x16   : > { %p1120_p4 = scmp.lt.s32.totalorder %s1111_s17, %s1111_s17 }
  0x17   : > { %p1114_p1 = pnand %p1112_p0, %p1102_p13 }
  0x18   : > { %p1121_p7 = por %p1120_p4, %p1119_p3 }
  0x19   : > { %p1115_p2 = pneg %p1114_p1 }
  0x1b   : > { %p1122_p8 = pnand %p1121_p7, %p1115_p2 }
  0x1d   : > { %1125 = shalt.err (!%p1122_p8)
}
  0x1e   : > { %s1251_s18 = smov 64   ;;  %s1252_s19 = smov 4  }
  0x1f   : > { %1011 = dma.hbm_to_vmem [thread:$0]  (!%p1351_p12), %s1509_s3, 1024, %s212_s11, [#allocation6], %s1251_s18, %s1251_s18, %s1252_s19  }
  0x20   : > { %s1137_s28 = scalar_lea.vmem %s199_s14, 1024  ;;  %p1145_p9 = scmp.lt.s32.totalorder %s199_s14, %s199_s14 }
  0x21   : > { %p1138_p11 = scmp.ne.s32.totalorder %s199_s14, %s1137_s28  ;;  %p1146_p6 = scmp.lt.s32.totalorder %s1137_s28, %s1137_s28 }
  0x23   : > { %p1140_p0 = pnand %p1138_p11, %p1102_p13  ;;  %p1147_p3 = por %p1146_p6, %p1145_p9 }
  0x25   : > { %p1141_p1 = pneg %p1140_p0 }
  0x27   : > { %p1148_p2 = pnand %p1147_p3, %p1141_p1 }
  0x29   : > { %1151 = shalt.err (!%p1148_p2)
}
  0x2a   : > { %1008 = dma.hbm_to_vmem [thread:$0]  (!%p1351_p12), %s1508_s2, 1024, %s199_s14, [#allocation3], %s1251_s18, %s1251_s18, %s1252_s19  }
  0x2b   : > { %s1163_s11 = scalar_lea.vmem %s225_s16, 1024  ;;  %p1171_p11 = scmp.lt.s32.totalorder %s225_s16, %s225_s16 }
  0x2c   : > { %p1164_p4 = scmp.ne.s32.totalorder %s225_s16, %s1163_s11  ;;  %p1172_p0 = scmp.lt.s32.totalorder %s1163_s11, %s1163_s11 }
  0x2e   : > { %p1166_p7 = pnand %p1164_p4, %p1102_p13  ;;  %p1173_p5 = por %p1172_p0, %p1171_p11 }
  0x30   : > { %p1167_p8 = pneg %p1166_p7 }
  0x32   : > { %p1174_p6 = pnand %p1173_p5, %p1167_p8 }
  0x34   : > { %1177 = shalt.err (!%p1174_p6)
}
  0x35   : > { %1014 = dma.hbm_to_vmem [thread:$0]  (!%p1351_p12), %s1510_s4, 1024, %s225_s16, [#allocation6], %s1251_s18, %s1251_s18, %s1252_s19  }
  0x36   : > { %252 = sbr.rel (%p1343_p10) target bundleno = 940 (0x3ac), region = 44  ;;  %p1519_p9 = scmp.eq.s32.totalorder (!%p1343_p10), %s1315_s25, 0 }
  0x3b   : > { %1221 = dma.done.wait (%p1519_p9), [#allocation3], 1024   ;;  %p1520_p13 = pmov %p1519_p9 }
  0x3c   : > { %p1521_p1 = pmov %p1519_p9 }
  0x3d   : > { %1223 = vsyncadd (%p1520_p13), [#allocation3], 4294966272 }
  0x3e   : > { %1225 = dma.done.wait (%p1521_p1), [#allocation6], 2048   ;;  %p1522_p5 = pmov %p1521_p1 }
  0x3f   : > { %s858_s12 = sshll.u32 %s1315_s25, 1  ;;  %v1253_v0 = vmov 0   ;;  %v1254_v1 = vmov 0.0   ;;  %v1068_v2 = vld [vmem:[%s1507_s1 + $0x4] ss:$8 sps:$4 sm:$0xff]   ;;  %vm317_vm0 = vcmask 130048   ;;  %v365_v15 = vlaneseq }
  0x40   : > { %1227 = vsyncadd (%p1522_p5), [#allocation6], 4294965248  ;;  %353 = vmatprep.mubr.bf16.mxu0 %v1253_v0  ;;  %p291_p12 = scmp.lt.s32.totalorder %s858_s12, 3  ;;  %931 = vmatprep.subr.bf16.mxu1 %v1254_v1  ;;  %v1070_v3 = vld [vmem:[%s1507_s1] ss:$8 sps:$4 sm:$0xff]   ;;  %v1072_v5 = vld [vmem:[#allocation2 + $0x38] sm:$0xff]  }
  0x41   : > { %335 = vmatprep.subr.bf16.mxu0 %v1068_v2  ;;  %932 = vmatpush3.bf16.msra.mxu1 %v1072_v5  ;;  %v1073_v6 = vld [vmem:[#allocation2 + $0x30] sm:$0xff]   ;;  %v1074_v7 = vld [vmem:[#allocation2 + $0x28] sm:$0xff]   ;;  %v1075_v8 = vld [vmem:[#allocation2 + $0x20] sm:$0xff]   ;;  %vm1255_vm1 = vmmov 0   ;;  %v1417_v16 = vshrl.u32 %v365_v15, 7  ;;  %s287_s10 = sand.u32 1, %s1238_s22  }
  0x42   : > { %s1530_s12 = smov (!%p291_p12, %s858_s12), 3  ;;  %336 = vmatpush1.bf16.msra.mxu0 %v1070_v3  ;;  %933 = vmatprep.subr.bf16.mxu1 %v1254_v1  ;;  %v1076_v9 = vld [vmem:[#allocation2 + $0x18] sm:$0xff]   ;;  %v1077_v10 = vld [vmem:[#allocation2 + $0x10] sm:$0xff]   ;;  %v1078_v11 = vld [vmem:[#allocation2 + $0x8] sm:$0xff]   ;;  %s857_s11 = sshll.u32 %s287_s10, 3 }
  0x43   : > { %s859_s9 = sshll.u32 %s1530_s12, 2  ;;  %951 = vmatprep.subr.bf16.mxu0 %v1254_v1  ;;  %v1079_v12 = vld [vmem:[#allocation2] sm:$0xff]   ;;  %947 = vmatprep.mubr.msk.bf16.mxu1 %vm1255_vm1, %v1254_v1  ;;  %v1080_v13 = vld [vmem:[#allocation5 + $0x38] sm:$0xff]   ;;  %v1081_v14 = vld [vmem:[#allocation5 + $0x30] sm:$0xff]   ;;  %v373_v17 = vsub.s32 0, %v1417_v16  ;;  %v367_v18 = vsub.s32 2, %v1417_v16 }
  0x44   : > { %s294_s17 = scalar_lea.vmem %s1506_s0, %s859_s9  ;;  %v1424_v19 = vld [vmem:[%s1511_s5] sm:$0xff]  ;;  %v1082_v31 = vld [vmem:[#allocation5 + $0x28] sm:$0xff]   ;;  %v1084_v33 = vld [vmem:[#allocation5 + $0x18] sm:$0xff]   ;;  %v398_v43 = vsub.s32 1, %v1417_v16  ;;  %s898_s13 = sshll.u32 %s1315_s25, 7 }
  0x45   : > { %v1071_v4 = vld [vmem:[%s294_s17] sm:$0xff]   ;;  %934 = vmatpush3.bf16.msra.mxu1 %v1073_v6  ;;  %v374_v20 = vrot.slane %v1424_v19, %v373_v17  ;;  %v1430_v21 = vrot.slane %v1424_v19, %v367_v18  ;;  %v1085_v34 = vld [vmem:[#allocation5 + $0x10] sm:$0xff]   ;;  %v1086_v35 = vld [vmem:[#allocation5 + $0x8] sm:$0xff]   ;;  %v564_v62 = vrot.slane %v1424_v19, 4  ;;  %s289_s15 = scalar_lea.vmem [#allocation8], %s857_s11  ;;  %s1462_s16 = scalar_lea.hbm %s1512_s6, %s898_s13 }
  0x46   : > { %863 = vmatmul.mubr.msk.bf16.vlgmr.msra.gmra.mxu0 %vm317_vm0, %v1071_v4  ;;  %935 = vmatprep.subr.bf16.mxu1 %v1254_v1  ;;  %v1083_v32 = vld [vmem:[#allocation5 + $0x20] sm:$0xff]   ;;  %v1088_v37 = vld [vmem:[#allocation7 + $0x38] sm:$0xff]   ;;  %v1089_v38 = vld [vmem:[#allocation7 + $0x30] sm:$0xff]   ;;  %v399_v45 = vrot.slane %v1424_v19, %v398_v43  ;;  %s754_s12 = sshll.u32 %s289_s15, 4  ;;  %s1466_s17 = scalar_lea.sflag [#allocation4], %s287_s10  ;;  %s1464_s12 = int_to_ptr.vmem [resolvable:$true] %s754_s12 }
  0x47   : > { %967 = vmatprep.mubr.msk.bf16.mxu0 %vm1255_vm1, %v1254_v1  ;;  %952 = vmatpush3.bf16.msra.mxu0 %v1080_v13  ;;  %v1087_v36 = vld [vmem:[#allocation5] sm:$0xff]   ;;  %v1090_v39 = vld [vmem:[#allocation7 + $0x28] sm:$0xff]   ;;  %v1092_v41 = vld [vmem:[#allocation7 + $0x18] sm:$0xff]   ;;  %s1178_s18 = scalar_lea.vmem %s1464_s12, 128  ;;  %p1523_p3 = scmp.ne.s32.totalorder %s1515_s7, 0 }
  0x48   : > { %953 = vmatprep.subr.bf16.mxu0 %v1254_v1  ;;  %v1091_v40 = vld [vmem:[#allocation7 + $0x20] sm:$0xff]   ;;  %v1093_v42 = vld [vmem:[#allocation7 + $0x10] sm:$0xff]   ;;  %v1094_v60 = vld [vmem:[#allocation7 + $0x8] sm:$0xff]   ;;  %p1179_p10 = scmp.ne.s32.totalorder %s1464_s12, %s1178_s18  ;;  %s1256_s25 = smov [#allocation8]  }
  0x49   : > { %936 = vmatpush3.bf16.msra.mxu1 %v1074_v7  ;;  %v1095_v61 = vld [vmem:[#allocation7] sm:$0xff]   ;;  %s1182_s19 = sshll.u32 %s1256_s25, 4  ;;  %s1183_s19 = int_to_ptr.vmem [resolvable:$false] %s1182_s19 }
  0x4a   : > { %937 = vmatprep.subr.bf16.mxu1 %v1254_v1  ;;  %p1180_p2 = pnand %p1179_p10, %p1523_p3  ;;  %s1184_s20 = scalar_lea.vmem %s1183_s19, 256 }
  0x4b   : > { %954 = vmatpush3.bf16.msra.mxu0 %v1081_v14  ;;  %p1185_p7 = scmp.lt.s32.totalorder %s1464_s12, %s1183_s19  ;;  %p1186_p8 = scmp.lt.s32.totalorder %s1184_s20, %s1178_s18 }
  0x4c   : > { %955 = vmatprep.subr.bf16.mxu0 %v1254_v1  ;;  %p1181_p4 = pneg %p1180_p2 }
  0x4d   : > { %938 = vmatpush3.bf16.msra.mxu1 %v1075_v8  ;;  %v672_v8 = vrot.slane %v1424_v19, 3  ;;  %p1187_p11 = por %p1186_p8, %p1185_p7 }
  0x4e   : > { %939 = vmatprep.subr.bf16.mxu1 %v1254_v1 }
  0x4f   : > { %956 = vmatpush3.bf16.msra.mxu0 %v1082_v31  ;;  %p1188_p0 = pnand %p1187_p11, %p1181_p4 }
  0x50   : > { %957 = vmatprep.subr.bf16.mxu0 %v1254_v1 }
  0x51   : > { %940 = vmatpush3.bf16.msra.mxu1 %v1076_v9 }
  0x52   : > { %941 = vmatprep.subr.bf16.mxu1 %v1254_v1 }
  0x53   : > { %958 = vmatpush3.bf16.msra.mxu0 %v1083_v32 }
  0x54   : > { %959 = vmatprep.subr.bf16.mxu0 %v1254_v1 }
  0x55   : > { %942 = vmatpush3.bf16.msra.mxu1 %v1077_v10 }
  0x56   : > { %943 = vmatprep.subr.bf16.mxu1 %v1254_v1 }
  0x57   : > { %960 = vmatpush3.bf16.msra.mxu0 %v1084_v33 }
  0x58   : > { %961 = vmatprep.subr.bf16.mxu0 %v1254_v1 }
  0x59   : > { %944 = vmatpush3.bf16.msra.mxu1 %v1078_v11 }
  0x5a   : > { %945 = vmatprep.subr.bf16.mxu1 %v1254_v1 }
  0x5b   : > { %962 = vmatpush3.bf16.msra.mxu0 %v1085_v34 }
  0x5c   : > { %963 = vmatprep.subr.bf16.mxu0 %v1254_v1 }
  0x5d   : > { %946 = vmatpush3.bf16.msra.mxu1 %v1079_v12 }
  0x5e   : > { %971 = vmatprep.subr.bf16.mxu1 %v1254_v1 }
  0x5f   : > { %964 = vmatpush3.bf16.msra.mxu0 %v1086_v35 }
  0x60   : > { %965 = vmatprep.subr.bf16.mxu0 %v1254_v1 }
  0x63   : > { %966 = vmatpush3.bf16.msra.mxu0 %v1087_v36 }
 0x106   : > { %v355_v22 = vpop.f32.mrf.mxu0 }
 0x107   : > { %v375_v24 = vadd.f32 %v374_v20, %v355_v22 }
 0x108   : > { %v357_v23 = vpop.f32.mrf.mxu0 }
 0x109   : > { %v1433_v25 = vadd.f32 %v1430_v21, %v357_v23  ;;  %v377_v28 = vmax.f32 %v375_v24, 0.0 }
 0x10a   : > { %v359_v26 = vpop.f32.mrf.mxu0 }
 0x10b   : > { %v376_v27 = vadd.f32 %v374_v20, %v359_v26 }
 0x10c   : > { %v361_v63 = vpop.f32.mrf.mxu0 }
 0x10d   : > { %v378_v29 = vmax.f32 %v376_v27, 0.0  ;;  %v370_v22 = vadd.f32 %v1430_v21, %v361_v63 }
 0x10f   : > { %v379_v30 = vpack.c.bf16 %v378_v29, %v377_v28 }
 0x111   : > { %948 = vmatmul.mubr.bf16.vlgmr.msra.gmra.mxu1 %v379_v30 }
 0x112   : > { %987 = vmatprep.mubr.msk.bf16.mxu1 %vm1255_vm1, %v1254_v1  ;;  %972 = vmatpush3.bf16.msra.mxu1 %v1088_v37 }
 0x113   : > { %973 = vmatprep.subr.bf16.mxu1 %v1254_v1 }
 0x116   : > { %974 = vmatpush3.bf16.msra.mxu1 %v1089_v38 }
 0x117   : > { %975 = vmatprep.subr.bf16.mxu1 %v1254_v1 }
 0x11a   : > { %976 = vmatpush3.bf16.msra.mxu1 %v1090_v39 }
 0x11b   : > { %977 = vmatprep.subr.bf16.mxu1 %v1254_v1 }
 0x11e   : > { %978 = vmatpush3.bf16.msra.mxu1 %v1091_v40 }
 0x11f   : > { %979 = vmatprep.subr.bf16.mxu1 %v1254_v1 }
 0x122   : > { %980 = vmatpush3.bf16.msra.mxu1 %v1092_v41 }
 0x123   : > { %981 = vmatprep.subr.bf16.mxu1 %v1254_v1 }
 0x126   : > { %982 = vmatpush3.bf16.msra.mxu1 %v1093_v42 }
 0x127   : > { %983 = vmatprep.subr.bf16.mxu1 %v1254_v1 }
 0x12a   : > { %984 = vmatpush3.bf16.msra.mxu1 %v1094_v60 }
 0x12b   : > { %985 = vmatprep.subr.bf16.mxu1 %v1254_v1 }
 0x12e   : > { %986 = vmatpush3.bf16.msra.mxu1 %v1095_v61 }
 0x1d1   : > { %v482_v44 = vpop.f32.mrf.mxu1 }
 0x1d2   : > { %v483_v48 = vadd.f32 %v482_v44, %v399_v45 }
 0x1d3   : > { %v949_v46 = vpop.f32.mrf.mxu1 }
 0x1d5   : > { %v485_v47 = vpop.f32.mrf.mxu1 }
 0x1d6   : > { %v486_v49 = vadd.f32 %v485_v47, %v399_v45 }
 0x1d7   : > { %v950_v50 = vpop.f32.mrf.mxu1 }
 0x1d8   : > { %v489_v51 = vadd.f32 %v486_v49, %v483_v48 }
 0x1da   : > { %v490_v52 = vrot.slane %v489_v51, 4 }
 0x1dc   : > { %v491_v53 = vadd.f32 %v490_v52, %v489_v51 }
 0x1de   : > { %v492_v54 = vrot.slane %v491_v53, 2 }
 0x1e0   : > { %v493_v55 = vadd.f32 %v492_v54, %v491_v53 }
 0x1e2   : > { %v494_v56 = vrot.slane %v493_v55, 1 }
 0x1e4   : > { %v495_v57 = vadd.f32 %v494_v56, %v493_v55 }
 0x1e6   : > { %v497_v58 = vmul.f32 0.0625, %v495_v57 }
 0x1e8   : > { %v498_v59 = vpack.c.bf16 %v497_v58, %v497_v58 }
 0x1ea   : > { %968 = vmatmul.mubr.bf16.vlgmr.msra.gmra.mxu0 %v498_v59 }
 0x2aa   : > { %v600_v0 = vpop.f32.mrf.mxu0 }
 0x2ab   : > { %v601_v2 = vadd.f32 %v600_v0, %v564_v62 }
 0x2ac   : > { %v969_v3 = vpop.f32.mrf.mxu0 }
 0x2ad   : > { %v606_v4 = vmax.f32 %v601_v2, 0.0 }
 0x2ae   : > { %v603_v5 = vpop.f32.mrf.mxu0 }
 0x2af   : > { %v607_v6 = vpack.c.bf16 %v606_v4, %v606_v4 }
 0x2b0   : > { %v970_v7 = vpop.f32.mrf.mxu0 }
 0x2b1   : > { %988 = vmatmul.mubr.bf16.vlgmr.msra.gmra.mxu1 %v607_v6 }
 0x371   : > { %v708_v9 = vpop.f32.mrf.mxu1 }
 0x372   : > { %v709_v10 = vadd.f32 %v708_v9, %v672_v8 }
 0x373   : > { %v989_v11 = vpop.f32.mrf.mxu1 }
 0x374   : > { %v888_v1 = vmul.f32 -1.442695, %v709_v10 }
 0x375   : > { %v711_v12 = vpop.f32.mrf.mxu1 }
 0x376   : > { %1096 = vpow2.f32 %v888_v1 }
 0x377   : > { %v990_v13 = vpop.f32.mrf.mxu1 }
 0x383   : > { %v1097_v14 = vpop.eup %1096 }
 0x384   : > { %v717_v15 = vadd.f32 1.0, %v1097_v14 }
 0x386   : > { %1098 = vrcp.f32 %v717_v15 }
 0x393   : > { %v1099_v18 = vpop.eup %1098 }
 0x394   : > { %v723_v20 = vrot.slane %v1099_v18, %v373_v17 }
 0x396   : > { %v724_v19 = vmul.f32 %v723_v20, %v483_v48  ;;  %v725_v23 = vmul.f32 %v723_v20, %v486_v49 }
 0x398   : > { %v726_v24 = vadd.f32 %v724_v19, %v1433_v25  ;;  %v727_v26 = vadd.f32 %v725_v23, %v370_v22 }
 0x39a   : > { %v728_v27 = vmax.f32 %v726_v24, 0.0  ;;  %v729_v28 = vmax.f32 %v727_v26, 0.0 }
 0x39c   : > { %v902_v16 = vpack.c.bf16 %v729_v28, %v728_v27 }
 0x39e   : > { %903 = vst [vmem:[%s289_s15] sm:$0xff] %v902_v16  }
 0x39f   : > { %1191 = shalt.err (!%p1188_p0)
}
 0x3a0   : > { %s1192_s26 = scalar_lea.hbm %s1462_s16, 128  ;;  %s1196_s10 = scalar_lea.hbm %s1512_s6, 256 }
 0x3a1   : > { %p1193_p6 = scmp.ne.s32.totalorder %s1462_s16, %s1192_s26  ;;  %p1197_p1 = scmp.lt.s32.totalorder %s1462_s16, %s1512_s6 }
 0x3a2   : > { %p1198_p5 = scmp.lt.s32.totalorder %s1196_s10, %s1192_s26 }
 0x3a3   : > { %p1194_p9 = pnand %p1193_p6, %p1523_p3 }
 0x3a4   : > { %p1199_p12 = por %p1198_p5, %p1197_p1 }
 0x3a5   : > { %p1195_p13 = pneg %p1194_p9 }
 0x3a7   : > { %p1200_p10 = pnand %p1199_p12, %p1195_p13 }
 0x3a9   : > { %1203 = shalt.err (!%p1200_p10)
}
 0x3aa   : > { %s1257_s15 = smov 64   ;;  %s1258_s9 = smov 4  }
 0x3ab   : > { %1003 = dma.vmem_to_hbm [thread:$0]  (%p1523_p3), %s1464_s12, 128, %s1462_s16, %s1466_s17, %s1257_s15, %s1257_s15, %s1258_s9  }
 0x3ac PF: > { %p1025_p2 = scmp.ge.s32.totalorder %s1246_s24, 2  ;;  %s769_s14 = sand.u32 1, %s1234_s21  }
 0x3ad   : > { %p1524_p4 = scmp.ne.s32.totalorder %s1516_s8, 0  ;;  %s770_s18 = scalar_lea.sflag [#allocation4], %s769_s14 }
 0x3af   : > { %p1016_p7 = pnand %p1025_p2, %p1524_p4 }
 0x3b1   : > { %p1017_p8 = pneg %p1016_p7 }
 0x3b3   : > { %1229 = dma.done.wait (%p1017_p8), %s770_s18, 128  }
 0x3b4   : > { %1231 = vsyncadd (%p1017_p8), %s770_s18, 4294967168  ;;  %p18_p11 = scmp.ge.s32.totalorder %s1319_s27, 4   ;;  %s1525_s21 = smov %s1238_s22 }
 0x3b5   : > { %s1526_s22 = smov %s1242_s23  ;;  %s1527_s23 = smov %s1330_s30 }
 0x3b6   : > { %s1528_s24 = smov %s1319_s27  ;;  %20 = sbr.rel (!%p18_p11) target bundleno = 5 (0x5), region = 92 }
 0x3bb   :  { %775 = vsyncpa [#allocation3], 1 }
 0x3bc   :  { %777 = vsyncpa [#allocation3 + $0x1], 1 }
 0x3bd   :  { %778 = vsyncpa [#allocation6], 1 }
 0x3be   :  { %779 = vsyncpa [#allocation4], 1 }
 0x3bf   :  { %781 = vsyncpa [#allocation4 + $0x1], 1 }

</bundles_post_ra>
